<compile_context>
chip_gen: v7x
topology: tpu7x:2x2x1
jax: 0.10.0
libtpu: 0.0.40
codegen_flags: <defaults>
</compile_context>

<pallas_src>
import math

import numpy as np
import jax
import jax.numpy as jnp
from jax.experimental import pallas as pl
from jax.experimental.pallas import tpu as pltpu

BN_EPS = 1e-5  # nn.BatchNorm2d default


# ----------------------------- Pallas kernel ---------------------------------
def _focus_kernel(x_ref, w_ref, b_ref, o_ref):
    # x_ref : (1, 4*c1, TS)   one batch, one spatial tile (lanes = spatial)
    # w_ref : (c2, 4*c1)      BN-scale-folded 1x1 conv weight
    # b_ref : (c2, 1)         BN-folded bias
    # o_ref : (1, c2, TS)
    z = jnp.dot(w_ref[...], x_ref[0], preferred_element_type=jnp.float32)  # (c2, TS) on MXU
    z = z + b_ref[...]                                                     # lane-broadcast bias
    # SiLU: keep exp + reciprocal on the EUP slot (VALU has no work to spare on v7x).
    sig = pl.reciprocal(1.0 + jnp.exp(-z), approx=False)
    o_ref[0] = (z * sig).astype(o_ref.dtype)


def _ceil_div(a, b):
    return -(-a // b)


def _plan_spatial_tiles(S, K4, c2, batch, *, elem_bytes=4,
                        max_block_bytes=24 << 20, lane_cap=32768):
    """Pick (tile_size, n_tiles, padded_S).

    Tile is a multiple of 128 lanes (unmasked stores), sized so the double-buffered
    X + out blocks stay under ~24 MiB (safe on v5e/v6e/v7x with vmem_limit_bytes=48 MiB),
    capped at 32768 lanes, and chosen so the grid has >= 2 total steps when possible
    (both v7x TensorCores get work).  S is padded up to n_tiles * tile.
    """
    per_lane = 2 * (K4 + c2) * elem_bytes            # double-buffered X + out bytes per column
    cap = (max_block_bytes // per_lane) // 128 * 128
    cap = max(128, min(lane_cap, cap))
    n_tiles = max(1, _ceil_div(S, cap))
    if batch * n_tiles < 2 and S > 128:              # keep both TensorCores busy
        n_tiles = 2
    ts = _ceil_div(_ceil_div(S, n_tiles), 128) * 128
    return ts, n_tiles, ts * n_tiles


# ------------------------------- wrapper --------------------------------------
def focus(x_nchw, conv_w, bn_gamma, bn_beta, bn_mean, bn_var, *, eps=BN_EPS):
    """Focus forward (k=1, s=1, g=1, act=SiLU, BatchNorm in eval mode).

    x_nchw : (b, c1, H, W) float32
    conv_w : (c2, 4*c1) or (c2, 4*c1, 1, 1) 1x1 conv weight; column order must be the
             PyTorch Focus concat order [even-even | odd-even | even-odd | odd-odd] x c1
             (a (c2, 4*c1, 1, 1) nn.Conv2d weight reshaped row-major matches).
    """
    # TODO(synk): Conv with k>1 / stride>1 / groups>1 and training-mode BatchNorm
    # (batch statistics) are not implemented; Focus defaults (k=1, s=1, g=1, eval BN) only.
    b, c1, H, W = x_nchw.shape
    assert H % 2 == 0 and W % 2 == 0
    H2, W2 = H // 2, W // 2
    S = H2 * W2
    K4 = 4 * c1
    if conv_w.ndim == 4:
        conv_w = conv_w.reshape(conv_w.shape[0], -1)
    c2 = conv_w.shape[0]
    assert conv_w.shape == (c2, K4)

    # ---- space-to-depth (Focus slicing), channels-first, spatial flattened on lanes ----
    # channel index in X = (col_parity*2 + row_parity)*c1 + ci  == PyTorch cat order.
    x6 = x_nchw.reshape(b, c1, H2, 2, W2, 2)                 # (b, c1, h2, rp, w2, cp)
    xs = jnp.transpose(x6, (0, 5, 3, 1, 2, 4)).reshape(b, K4, S).astype(jnp.float32)

    # ---- fold eval-mode BatchNorm into the conv weight / bias (host-side, free) ----
    scale = bn_gamma * jax.lax.rsqrt(bn_var + eps)           # (c2,)
    w_eff = (conv_w * scale[:, None]).astype(jnp.float32)    # (c2, 4*c1)
    bias = (bn_beta - bn_mean * scale).reshape(c2, 1).astype(jnp.float32)

    # ---- tiling plan: large lane-dense tiles, padded spatial, >= 2 grid steps ----
    ts, n_tiles, S_pad = _plan_spatial_tiles(S, K4, c2, b)
    if S_pad != S:
        xs = jnp.pad(xs, ((0, 0), (0, 0), (0, S_pad - S)))   # fused with the transpose by XLA
    grid = (b, n_tiles)

    cost = pl.CostEstimate(
        flops=2 * b * c2 * K4 * S_pad,
        transcendentals=b * c2 * S_pad,
        bytes_accessed=4 * (b * K4 * S_pad + b * c2 * S_pad + c2 * K4 + c2),
    )

    out = pl.pallas_call(
        _focus_kernel,
        out_shape=jax.ShapeDtypeStruct((b, c2, S_pad), jnp.float32),
        grid_spec=pltpu.PrefetchScalarGridSpec(
            num_scalar_prefetch=0,
            grid=grid,
            in_specs=[
                pl.BlockSpec((1, K4, ts), lambda bi, si: (bi, 0, si)),
                pl.BlockSpec((c2, K4), lambda bi, si: (0, 0)),
                pl.BlockSpec((c2, 1), lambda bi, si: (0, 0)),
            ],
            out_specs=pl.BlockSpec((1, c2, ts), lambda bi, si: (bi, 0, si)),
        ),
        compiler_params=pltpu.CompilerParams(
            dimension_semantics=("parallel", "parallel"),
            vmem_limit_bytes=48 * 1024 * 1024,
        ),
        cost_estimate=cost,
    )(xs, w_eff, bias)

    if S_pad != S:
        out = out[:, :, :S]
    return out.reshape(b, c2, H2, W2)   # free contiguous reshape back to NCHW


# --------------------- pure-JAX reference (PyTorch semantics) ---------------------
def _reference(x, conv_w, bn_gamma, bn_beta, bn_mean, bn_var, eps=BN_EPS):
    x_ee = x[..., ::2, ::2]
    x_oe = x[..., 1::2, ::2]
    x_eo = x[..., ::2, 1::2]
    x_oo = x[..., 1::2, 1::2]
    y = jnp.concatenate([x_ee, x_oe, x_eo, x_oo], axis=1)          # (b, 4c1, H2, W2)
    z = jnp.einsum("oc,bchw->bohw", conv_w, y,
                   precision=jax.lax.Precision.HIGHEST)            # 1x1 conv, no bias
    inv = jax.lax.rsqrt(bn_var + eps)
    z = (z - bn_mean[None, :, None, None]) * (bn_gamma * inv)[None, :, None, None] \
        + bn_beta[None, :, None, None]
    return z * jax.nn.sigmoid(z)                                   # SiLU


# ----------------------------------- test ------------------------------------------
if __name__ == "__main__":
    # Focus(c1=4, c2=32, k=1, s=1, g=1, act=True) in eval mode; input (2, 4, 16, 16).
    b, c1, spatial, c2 = 2, 4, 16, 32

    key = jax.random.PRNGKey(0)
    ks = jax.random.split(key, 6)

    x = jax.random.normal(ks[0], (b, c1, spatial, spatial), dtype=jnp.float32)

    conv_w = (0.1 * jax.random.normal(ks[1], (c2, 4 * c1))).astype(jnp.float32)
    bn_gamma = (1.0 + 0.1 * jax.random.normal(ks[2], (c2,))).astype(jnp.float32)
    bn_beta = (0.1 * jax.random.normal(ks[3], (c2,))).astype(jnp.float32)
    bn_mean = (0.1 * jax.random.normal(ks[4], (c2,))).astype(jnp.float32)
    bn_var = (0.5 + jax.random.uniform(ks[5], (c2,))).astype(jnp.float32)

    out = focus(x, conv_w, bn_gamma, bn_beta, bn_mean, bn_var)
    out = jax.block_until_ready(out)

    ref = jax.block_until_ready(
        _reference(x, conv_w, bn_gamma, bn_beta, bn_mean, bn_var))

    np.testing.assert_allclose(np.asarray(out), np.asarray(ref), rtol=2e-4, atol=2e-4)
    assert out.shape == (b, c2, spatial // 2, spatial // 2)
    assert out.dtype == jnp.float32

    # Also exercise a non-128-divisible spatial size (the previously flagged robustness bug).
    x2 = jax.random.normal(ks[0], (1, c1, 20, 20), dtype=jnp.float32)   # S = 100, padded to 128
    out2 = jax.block_until_ready(focus(x2, conv_w, bn_gamma, bn_beta, bn_mean, bn_var))
    ref2 = jax.block_until_ready(_reference(x2, conv_w, bn_gamma, bn_beta, bn_mean, bn_var))
    np.testing.assert_allclose(np.asarray(out2), np.asarray(ref2), rtol=2e-4, atol=2e-4)

    print("KERNEL_OK")
</pallas_src>

<mosaic_0001>
module attributes {stable_mosaic.version = 11 : i64} {
  func.func @_focus_kernel(%arg0: i32, %arg1: i32, %arg2: memref<1x16x128xf32, #tpu.memory_space<vmem>>, %arg3: memref<32x16xf32, #tpu.memory_space<vmem>>, %arg4: memref<32x1xf32, #tpu.memory_space<vmem>>, %arg5: memref<1x32x128xf32, #tpu.memory_space<vmem>>) attributes {dimension_semantics = [#tpu.dimension_semantics<parallel>, #tpu.dimension_semantics<parallel>], iteration_bounds = array<i64: 2, 1>, scalar_prefetch = 0 : i64, scratch_operands = 0 : i64, tpu.core_type = #tpu.core_type<tc>, window_params = [{transform_indices = @transform_0, window_bounds = array<i64: 1, 16, 128>}, {pipeline_mode = #tpu.pipeline_mode<synchronous>, transform_indices = @transform_1, window_bounds = array<i64: 32, 16>}, {pipeline_mode = #tpu.pipeline_mode<synchronous>, transform_indices = @transform_2, window_bounds = array<i64: 32, 1>}, {transform_indices = @transform_3, window_bounds = array<i64: 1, 32, 128>}]} {
    %c0 = arith.constant 0 : index
    %c0_0 = arith.constant 0 : index
    %0 = vector.load %arg3[%c0, %c0_0] : memref<32x16xf32, #tpu.memory_space<vmem>>, vector<32x16xf32>
    %c0_1 = arith.constant 0 : index
    %c0_2 = arith.constant 0 : index
    %c0_3 = arith.constant 0 : index
    %1 = vector.load %arg2[%c0_1, %c0_2, %c0_3] : memref<1x16x128xf32, #tpu.memory_space<vmem>>, vector<1x16x128xf32>
    %2 = vector.shape_cast %1 : vector<1x16x128xf32> to vector<16x128xf32>
    %cst = arith.constant dense<0.000000e+00> : vector<32x128xf32>
    %3 = tpu.matmul %0, %2, %cst {dimension_numbers = #tpu.dot_dimension_numbers<[1], [0], [0], [1], [0, 0, 1, 1], [], []>} : vector<32x16xf32>, vector<16x128xf32>, vector<32x128xf32> -> vector<32x128xf32>
    %c0_4 = arith.constant 0 : index
    %c0_5 = arith.constant 0 : index
    %4 = vector.load %arg4[%c0_4, %c0_5] : memref<32x1xf32, #tpu.memory_space<vmem>>, vector<32x1xf32>
    %5 = vector.broadcast %4 : vector<32x1xf32> to vector<32x128xf32>
    %6 = arith.addf %3, %5 : vector<32x128xf32>
    %cst_6 = arith.constant 0.000000e+00 : f32
    %7 = vector.broadcast %cst_6 : f32 to vector<32x128xf32>
    %8 = arith.subf %7, %6 : vector<32x128xf32>
    %9 = math.exp %8 : vector<32x128xf32>
    %cst_7 = arith.constant 1.000000e+00 : f32
    %10 = vector.broadcast %cst_7 : f32 to vector<32x128xf32>
    %11 = arith.addf %10, %9 : vector<32x128xf32>
    %12 = tpu.reciprocal %11 : vector<32x128xf32> -> vector<32x128xf32>
    %13 = arith.mulf %6, %12 : vector<32x128xf32>
    %c0_8 = arith.constant 0 : index
    %c0_9 = arith.constant 0 : index
    %c0_10 = arith.constant 0 : index
    %14 = vector.load %arg5[%c0_8, %c0_9, %c0_10] : memref<1x32x128xf32, #tpu.memory_space<vmem>>, vector<1x32x128xf32>
    %15 = vector.shape_cast %14 : vector<1x32x128xf32> to vector<32x128xf32>
    %16 = vector.shape_cast %13 : vector<32x128xf32> to vector<1x32x128xf32>
    tpu.vector_store %arg5[%c0_8, %c0_9, %c0_10], %16 {strides = array<i32>} : memref<1x32x128xf32, #tpu.memory_space<vmem>>, vector<1x32x128xf32>,
    return
  }
  func.func @transform_0(%arg0: i32, %arg1: i32) -> (i32, i32, i32) {
    %c0_i32 = arith.constant 0 : i32
    %c0_i32_0 = arith.constant 0 : i32
    return %arg0, %c0_i32, %arg1 : i32, i32, i32
  }
  func.func @transform_1(%arg0: i32, %arg1: i32) -> (i32, i32) {
    %c0_i32 = arith.constant 0 : i32
    %c0_i32_0 = arith.constant 0 : i32
    %c0_i32_1 = arith.constant 0 : i32
    return %c0_i32, %c0_i32_0 : i32, i32
  }
  func.func @transform_2(%arg0: i32, %arg1: i32) -> (i32, i32) {
    %c0_i32 = arith.constant 0 : i32
    %c0_i32_0 = arith.constant 0 : i32
    %c0_i32_1 = arith.constant 0 : i32
    return %c0_i32, %c0_i32_0 : i32, i32
  }
  func.func @transform_3(%arg0: i32, %arg1: i32) -> (i32, i32, i32) {
    %c0_i32 = arith.constant 0 : i32
    %c0_i32_0 = arith.constant 0 : i32
    return %arg0, %c0_i32, %arg1 : i32, i32, i32
  }
}

</mosaic_0001>

<bundles_post_ra>
// kernel: tpu_custom_call.1
= control target key start
LH: loop header
LB: loop body
LE: loop exit
PB: predicated region body
PF: predicated region fallthrough
CT: control target
= control target key end

     0   :  { %8 = vsyncpa [#allocation3], 0  ;;  %s807_s0 = inlined_call_operand.vmem [shape: f32[2,16,128], index: 0, kind: input, shape index: {}]   ;;  %s808_s1 = inlined_call_operand.vmem [shape: f32[32,16], index: 1, kind: input, shape index: {}]   ;;  %s809_s2 = inlined_call_operand.vmem [shape: f32[32,1], index: 2, kind: input, shape index: {}]   ;;  %s810_s3 = inlined_call_operand.hbm [shape: f32[2,32,128], index: 3, kind: output, shape index: {}]  }
   0x1   :  { %10 = vsyncpa [#allocation3 + $0x1], 0  ;;  %s664_s12 = smov 0   ;;  %s666_s13 = smov 0  }
   0x2   :  { %s668_s14 = smov 0   ;;  %s670_s15 = smov 0  }
   0x3   :  { %s672_s16 = smov 0   ;;  %s674_s17 = smov 0  }
   0x4 LB: > { %s443_s18 = sadd.s32 4294967295, %s638_s17   ;;  %s444_s19 = sadd.s32 4294967294, %s638_s17   ;;  %s638_s17 = sphi %s674_s17, %s16_s17   ;;  %s634_s16 = sphi %s672_s16, %s817_s16   ;;  %s630_s15 = sphi %s670_s15, %s816_s15   ;;  %s626_s14 = sphi %s668_s14, %s815_s14   ;;  %s622_s13 = sphi %s666_s13, %s814_s13   ;;  %s618_s12 = sphi %s664_s12, %s813_s12  }
   0x5   : > { %s28_s20 = sadd.s32 1, %s634_s16  ;;  %s107_s21 = sadd.s32 1, %s626_s14 }
   0x6   : > { %p30_p0 = scmp.ge.s32.totalorder %s28_s20, 2  ;;  %p117_p1 = scmp.ne.s32.totalorder %s626_s14, %s622_s13 }
   0x7   : > { %p118_p2 = scmp.eq.s32.totalorder %s443_s18, 1  ;;  %p123_p3 = scmp.ne.s32.totalorder %s622_s13, %s618_s12 }
   0x8   : > { %s819_s20 = smov (%p30_p0, %s28_s20), 0  ;;  %p124_p5 = scmp.eq.s32.totalorder %s444_s19, 1 }
   0x9   : > { %p704_p4 = por %p118_p2, %p117_p1  ;;  %s102_s23 = ssub.s32 %s634_s16, %s819_s20 }
   0xa   : > { %p447_p6 = scmp.ge.s32.totalorder %s638_s17, 1  ;;  %p105_p7 = scmp.eq.s32.totalorder %s102_s23, 0 }
   0xb   : > { %p711_p8 = por %p124_p5, %p123_p3  ;;  %p159_p9 = scmp.lt.s32.totalorder %s638_s17, 3 }
   0xc   : > { %s717_s25 = scalar_select %p105_p7, %s626_s14, %s107_s21  }
   0xd   : > { %p160_p10 = pnand %p447_p6, %p159_p9 }
   0xe   : > { %p186_p11 = scmp.lt.s32.totalorder (!%p160_p10), %s630_s15, 1  ;;  %v194_v0 = vld [vmem:[%s808_s1] sm:$0xff] (!%p160_p10)  ;;  %vm224_vm0 = vcmask (!%p160_p10), 130048   ;;  %v196_v1 = vld [vmem:[%s808_s1 + $0x10] sm:$0xff] (!%p160_p10)  ;;  %v640_v4 = vmov (!%p160_p10), 0   ;;  %v203_v5 = vld [vmem:[%s809_s2 + $0x18] sm:$0xff] (!%p160_p10) }
   0xf   : > { %163 = sbr.rel (%p160_p10) target bundleno = 295 (0x127), region = 32  ;;  %472 = vmatprep.mubr.msk.f32.mxu0 (!%p160_p10), %vm224_vm0, %v194_v0  ;;  %475 = vmatprep.mubr.msk.f32.mxu1 (!%p160_p10), %vm224_vm0, %v196_v1  ;;  %v202_v2 = vld [vmem:[%s809_s2 + $0x10] sm:$0xff] (!%p160_p10)  ;;  %v200_v3 = vld [vmem:[%s809_s2] sm:$0xff] (!%p160_p10)  ;;  %v201_v6 = vld [vmem:[%s809_s2 + $0x8] sm:$0xff] (!%p160_p10)  ;;  %s183_s30 = sand.u32 (!%p160_p10), 1, %s622_s13  }
  0x10   : > { %543 = vset.pattern.permute.xlu1 (!%p160_p10), %v640_v4  ;;  %542 = vset.pattern.permute.xlu0 (!%p160_p10), %v640_v4  ;;  %v195_v10 = vld [vmem:[%s808_s1 + $0x8] sm:$0xff] (!%p160_p10)  ;;  %v197_v11 = vld [vmem:[%s808_s1 + $0x18] sm:$0xff] (!%p160_p10)  ;;  %s448_s4 = sshll.u32 (!%p160_p10), %s183_s30, 5  ;;  %s641_s18 = smov (!%p160_p10), [#allocation2]  }
  0x11   : > { %216 = vperm.xlu1 (!%p160_p10), %543, %v202_v2   ;;  %206 = vperm.xlu0 (!%p160_p10), %542, %v200_v3   ;;  %s185_s5 = scalar_lea.vmem (!%p160_p10), [#allocation2], %s448_s4  ;;  %s564_s19 = sshll.u32 (!%p160_p10), %s641_s18, 4  ;;  %s565_s19 = int_to_ptr.vmem [resolvable:$false] %s564_s19 }
  0x12   : > { %s365_s6 = sshll.u32 (!%p160_p10), %s185_s5, 4  ;;  %s566_s21 = scalar_lea.vmem (!%p160_p10), %s565_s19, 1024  ;;  %s754_s6 = int_to_ptr.vmem [resolvable:$true] %s365_s6 }
  0x13   : > { %s560_s11 = scalar_lea.vmem (!%p160_p10), %s754_s6, 512  ;;  %p567_p1 = scmp.lt.s32.totalorder (!%p160_p10), %s754_s6, %s565_s19 }
  0x14   : > { %p561_p12 = scmp.ne.s32.totalorder (!%p160_p10), %s754_s6, %s560_s11  ;;  %p568_p2 = scmp.lt.s32.totalorder (!%p160_p10), %s566_s21, %s560_s11 }
  0x15   : > { %221 = vperm.xlu1 (!%p160_p10), %543, %v203_v5   ;;  %211 = vperm.xlu0 (!%p160_p10), %542, %v201_v6  }
  0x16   : > { %s187_s7 = scalar_select %p186_p11, %s630_s15, 1 }
  0x17   : > { %p562_p13 = pnand %p561_p12, %p704_p4  ;;  %p569_p3 = por %p568_p2, %p567_p1 }
  0x18   : > { %s460_s8 = sshll.u32 %s187_s7, 4  ;;  %s461_s7 = sshll.u32 %s630_s15, 9 }
  0x19   : > { %s193_s23 = scalar_lea.vmem %s807_s0, %s460_s8  ;;  %s759_s10 = scalar_lea.hbm %s810_s3, %s461_s7 }
  0x1a   : > { %v198_v7 = vld [vmem:[%s193_s23] sm:$0xff]  ;;  %v199_v8 = vld [vmem:[%s193_s23 + $0x8] sm:$0xff]  ;;  %s761_s15 = scalar_lea.sflag [#allocation3], %s183_s30  ;;  %p563_p0 = pneg %p562_p13 }
  0x1b   : > { %v478_v9 = vpack.c.bf16 %v199_v8, %v198_v7 }
  0x1c   : > { %p570_p5 = pnand %p569_p3, %p563_p0 }
  0x1d   : > { %479 = vmatprep.subr.bf16.mxu0 %v478_v9  ;;  %482 = vmatprep.subr.bf16.mxu1 %v478_v9 }
  0x1e   : > { %481 = vmatpush3.bf16.msra.mxu0 %v478_v9  ;;  %483 = vmatpush3.bf16.msra.mxu1 %v478_v9 }
  0x21   : > { %473 = vmatmul.mubr.msk.f32.vlgmr.msra.gmra.mrb[0].mxu0 %vm224_vm0, %v195_v10  ;;  %476 = vmatmul.mubr.msk.f32.vlgmr.msra.gmra.mrb[0].mxu1 %vm224_vm0, %v197_v11 }
  0x90   : > { %v217_v12 = vpop.permute.xlu1 %216  ;;  %v207_v13 = vpop.permute.xlu0 %206 }
  0x94   : > { %v222_v14 = vpop.permute.xlu1 %221  ;;  %v212_v15 = vpop.permute.xlu0 %211 }
  0xf4   : > { %v474_v16 = vpop.f32.mrb[0].mxu0  ;;  %v477_v17 = vpop.f32.mrb[0].mxu1 }
  0xf5   : > { %v309_v18 = vadd.f32 %v474_v16, %v212_v15  ;;  %v319_v19 = vadd.f32 %v477_v17, %v222_v14  ;;  %v303_v20 = vpop.f32.mrb[1].mxu0  ;;  %v313_v21 = vpop.f32.mrb[1].mxu1 }
  0xf6   : > { %v304_v22 = vadd.f32 %v303_v20, %v207_v13  ;;  %v314_v23 = vadd.f32 %v313_v21, %v217_v12 }
  0xf7   : > { %v323_v24 = vsub.f32 0.0, %v309_v18  ;;  %v325_v25 = vsub.f32 0.0, %v319_v19 }
  0xf8   : > { %v322_v26 = vsub.f32 0.0, %v304_v22  ;;  %v324_v27 = vsub.f32 0.0, %v314_v23 }
  0xf9   : > { %v328_v28 = vmul.f32 1.442695, %v323_v24  ;;  %v332_v29 = vmul.f32 1.442695, %v325_v25 }
  0xfa   : > { %v326_v30 = vmul.f32 1.442695, %v322_v26  ;;  %v330_v31 = vmul.f32 1.442695, %v324_v27 }
  0xfb   : > { %544 = vpow2.f32 %v328_v28 }
  0xfc   : > { %546 = vpow2.f32 %v332_v29 }
  0xfd   : > { %548 = vpow2.f32 %v326_v30 }
  0xfe   : > { %550 = vpow2.f32 %v330_v31 }
 0x105   : > { %v545_v32 = vpop.eup %544 }
 0x106   : > { %v547_v33 = vpop.eup %546  ;;  %v335_v34 = vadd.f32 1.0, %v545_v32 }
 0x107   : > { %v549_v35 = vpop.eup %548  ;;  %v337_v36 = vadd.f32 1.0, %v547_v33 }
 0x108   : > { %v551_v37 = vpop.eup %550  ;;  %552 = vrcp.f32 %v335_v34  ;;  %v334_v38 = vadd.f32 1.0, %v549_v35 }
 0x109   : > { %554 = vrcp.f32 %v337_v36  ;;  %v336_v39 = vadd.f32 1.0, %v551_v37 }
 0x10a   : > { %556 = vrcp.f32 %v334_v38 }
 0x10b   : > { %558 = vrcp.f32 %v336_v39 }
 0x112   : > { %v553_v40 = vpop.eup %552 }
 0x113   : > { %v555_v41 = vpop.eup %554  ;;  %v343_v42 = vmul.f32 %v553_v40, %v309_v18 }
 0x114   : > { %v557_v43 = vpop.eup %556  ;;  %v345_v44 = vmul.f32 %v555_v41, %v319_v19 }
 0x115   : > { %v559_v45 = vpop.eup %558  ;;  %347 = vst [vmem:[%s185_s5 + $0x8] sm:$0xff] %v343_v42  ;;  %v342_v46 = vmul.f32 %v557_v43, %v304_v22 }
 0x116   : > { %349 = vst [vmem:[%s185_s5 + $0x18] sm:$0xff] %v345_v44  ;;  %v344_v47 = vmul.f32 %v559_v45, %v314_v23 }
 0x117   : > { %346 = vst [vmem:[%s185_s5] sm:$0xff] %v342_v46 }
 0x118   : > { %348 = vst [vmem:[%s185_s5 + $0x10] sm:$0xff] %v344_v47 }
 0x119   : > { %573 = shalt.err (!%p570_p5)
}
 0x11a   : > { %s574_s23 = scalar_lea.hbm %s759_s10, 512  ;;  %s578_s28 = scalar_lea.hbm %s810_s3, 1024 }
 0x11b   : > { %p575_p6 = scmp.ne.s32.totalorder %s759_s10, %s574_s23  ;;  %p579_p10 = scmp.lt.u32.totalorder %s759_s10, %s810_s3 }
 0x11c   : > { %p580_p11 = scmp.lt.u32.totalorder %s578_s28, %s574_s23  ;;  %p582_p13 = scmp.lt.u32.totalorder %s574_s23, %s759_s10 }
 0x11d   : > { %p576_p7 = pnand %p575_p6, %p704_p4 }
 0x11e   : > { %p581_p12 = por %p580_p11, %p579_p10 }
 0x11f   : > { %p577_p9 = pneg %p576_p7 }
 0x120   : > { %p583_p0 = por %p582_p13, %p581_p12 }
 0x122   : > { %p584_p1 = pnand %p583_p0, %p577_p9 }
 0x124   : > { %587 = shalt.err (!%p584_p1)
}
 0x125   : > { %s642_s4 = smov 128   ;;  %s643_s5 = smov 8  }
 0x126   : > { %484 = dma.vmem_to_hbm [thread:$0]  (%p704_p4), %s754_s6, 512, %s759_s10, %s761_s15, %s642_s4, %s642_s4, %s643_s5  }
 0x127 PF: > { %p490_p2 = scmp.ge.s32.totalorder %s638_s17, 2  ;;  %s380_s7 = sand.u32 1, %s618_s12  }
 0x128   : > { %s381_s8 = scalar_lea.sflag [#allocation3], %s380_s7 }
 0x129   : > { %p487_p3 = pnand %p490_p2, %p711_p8 }
 0x12b   : > { %613 = dma.done.wait (!%p487_p3), %s381_s8, 512  }
 0x12c   : > { %615 = vsyncadd (!%p487_p3), %s381_s8, 4294966784  ;;  %s16_s17 = sadd.s32 1, %s638_s17   ;;  %s813_s12 = smov %s622_s13 }
 0x12d   : > { %p13_p5 = scmp.ge.s32.totalorder %s16_s17, 4   ;;  %s814_s13 = smov %s626_s14 }
 0x12e   : > { %s815_s14 = smov %s717_s25  ;;  %s816_s15 = smov %s634_s16 }
 0x12f   : > { %s817_s16 = smov %s819_s20  ;;  %15 = sbr.rel (!%p13_p5) target bundleno = 4 (0x4), region = 67 }
 0x136   :  { %386 = vsyncpa [#allocation3], 1 }
 0x137   :  { %388 = vsyncpa [#allocation3 + $0x1], 1 }

</bundles_post_ra>
